<compile_context>
chip_gen: v6e
topology: v6e:2x2x1
jax: 0.10.0
libtpu: 0.0.40
codegen_flags: <defaults>
</compile_context>

<pallas_src>
import math

import jax
import jax.numpy as jnp
from jax.experimental import pallas as pl
from jax.experimental.pallas import tpu as pltpu


def _round_up(x, m):
    return ((x + m - 1) // m) * m


def _physical_vmem_bytes():
    try:
        return int(pltpu.get_tpu_info().vmem_capacity_bytes)
    except Exception:
        return 64 * 1024 * 1024  # conservative (v7x-sized) fallback


def _plan_m(M, tm, tk):
    """Clamp tiles to the problem and pick the padded node count M_p."""
    M128 = _round_up(max(M, 1), 128)
    tm = min(tm, M128)
    tk = min(tk, M128)
    # Shrink tk (then tm) only when that actually reduces the lcm padding.
    while (tk > max(tm, 128) and (tk // 2) % 128 == 0
           and _round_up(M, math.lcm(tm, tk // 2)) < _round_up(M, math.lcm(tm, tk))):
        tk //= 2
    while (tm > 128 and (tm // 2) % 8 == 0
           and _round_up(M, math.lcm(tm // 2, tk)) < _round_up(M, math.lcm(tm, tk))):
        tm //= 2
    M_p = _round_up(M, math.lcm(tm, tk))
    return tm, tk, M_p


def prepare_adjacency(adj, *, tm=512, tk=1024, compute_dtype=jnp.bfloat16):
    """Pad + cast a dense [M, M] adjacency once (reuse across GCN layers).

    graph_convolution_forward accepts the returned matrix directly and skips
    its own per-call pad/cast pass when the shapes/dtype already match.
    """
    M = adj.shape[0]
    assert adj.shape == (M, M)
    _, _, M_p = _plan_m(M, tm, tk)
    return jnp.pad(adj, ((0, M_p - M), (0, M_p - M))).astype(compute_dtype)


def _make_fused_kernel(tk, resident):
    """out_tile = relu((adj_row_strip @ v) @ W), K-tiled over the node axis."""

    def kernel(adj_ref, v_ref, w_ref, out_ref, acc_ref):
        k = pl.program_id(1)

        @pl.when(k == 0)
        def _init():
            acc_ref[...] = jnp.zeros_like(acc_ref)

        if resident:
            # v is fully VMEM-resident (single DMA); slice this step's K tile.
            start = pl.multiple_of(k * tk, tk)
            v_blk = v_ref[pl.ds(start, tk), :]
        else:
            v_blk = v_ref[...]

        acc_ref[...] += jnp.dot(adj_ref[...], v_blk,
                                preferred_element_type=jnp.float32)

        @pl.when(k == pl.num_programs(1) - 1)
        def _finalize():
            # NOTE: the f32 support accumulator is cast back to bf16 before the
            # second MXU matmul; combined with the bf16 adjacency this gives
            # ~1e-2 relative error vs an f32 reference (single-pass MXU speed
            # trade-off, covered by the relaxed tolerance below).
            z = jnp.dot(acc_ref[...].astype(w_ref.dtype), w_ref[...],
                        preferred_element_type=jnp.float32)
            out_ref[...] = jnp.maximum(z, 0.0).astype(out_ref.dtype)

    return kernel


def _make_premul_kernel(tk, resident):
    """out_tile = relu(adj_row_strip @ h), h = v @ W^T precomputed (narrow out)."""

    def kernel(adj_ref, h_ref, out_ref, acc_ref):
        k = pl.program_id(1)

        @pl.when(k == 0)
        def _init():
            acc_ref[...] = jnp.zeros_like(acc_ref)

        if resident:
            start = pl.multiple_of(k * tk, tk)
            h_blk = h_ref[pl.ds(start, tk), :]
        else:
            h_blk = h_ref[...]

        acc_ref[...] += jnp.dot(adj_ref[...], h_blk,
                                preferred_element_type=jnp.float32)

        @pl.when(k == pl.num_programs(1) - 1)
        def _finalize():
            out_ref[...] = jnp.maximum(acc_ref[...], 0.0).astype(out_ref.dtype)

    return kernel


def graph_convolution_forward(v, adj, weight, *, tm=512, tk=1024,
                              compute_dtype=jnp.bfloat16):
    """Pallas-backed GraphConvolution.forward (eval mode, bias=False).

    v      : [B, N, F_in] or [M, F_in] float32 node features
    adj    : [M, M] dense adjacency (M = B*N), OR the output of
             prepare_adjacency() (already padded to [M_p, M_p] + cast)
    weight : [F_out, F_in]  (torch nn.Linear convention)

    Returns (output, adj) with output shaped like v but with F_out features.
    """
    assert tm % 8 == 0 and tk % 128 == 0
    v_shape = v.shape
    v_flat = v.reshape(-1, v_shape[-1]) if v.ndim > 2 else v
    M, f_in = v_flat.shape
    f_out = weight.shape[0]
    out_dtype = v.dtype

    tm, tk, M_p = _plan_m(M, tm, tk)
    f_in_p = _round_up(f_in, 128)
    f_out_p = _round_up(f_out, 128)

    # Adjacency: reuse a pre-prepared (padded + cast) matrix when given,
    # otherwise pad/cast here (zero rows/cols, sliced off below).
    if adj.shape == (M_p, M_p) and adj.dtype == compute_dtype:
        adj_p = adj
    else:
        assert adj.shape == (M, M), f"adj shape {adj.shape} != ({M}, {M})"
        adj_p = jnp.pad(adj, ((0, M_p - M), (0, M_p - M))).astype(compute_dtype)

    # Association order on the *padded* widths: if the output is narrower than
    # the input, apply the linear layer first and run the big M^2 matmul at
    # the narrow width (M^2*F_out + M*F_in*F_out vs M^2*F_in + M*F_in*F_out).
    use_premul = f_out_p < f_in_p
    width = f_out_p if use_premul else f_in_p

    # ---- per-generation VMEM budget & residency decision -------------------
    phys = _physical_vmem_bytes()            # 128 MiB v5e/v6e, 64 MiB v7x
    budget = (phys * 4) // 5                 # headroom for compiler internals
    resident_cap = phys // 4                 # ~32 MiB v5e/v6e, ~16 MiB v7x

    bpe = jnp.dtype(compute_dtype).itemsize  # 2 for bf16
    out_bpe = jnp.dtype(out_dtype).itemsize
    base_need = (2 * tm * tk * bpe           # adjacency tiles (double-buffered)
                 + 2 * tm * f_out_p * out_bpe  # output tiles (double-buffered)
                 + tm * width * 4)           # f32 accumulator scratch
    if not use_premul:
        base_need += 2 * f_in_p * f_out_p * bpe  # grid-invariant weight (2 bufs)
    feat_resident = 2 * M_p * width * bpe        # constant index_map, 2 bufs
    feat_streamed = 2 * tk * width * bpe
    resident = (M_p * width * bpe <= resident_cap
                and base_need + feat_resident <= budget)
    need = base_need + (feat_resident if resident else feat_streamed)
    vmem_limit = int(min(budget, max(32 * 1024 * 1024,
                                     2 * need + 8 * 1024 * 1024)))

    compiler_params = pltpu.CompilerParams(
        dimension_semantics=("parallel", "arbitrary"),  # rows shard across TCs
        vmem_limit_bytes=vmem_limit,
    )

    grid = (M_p // tm, M_p // tk)
    row_strips = M_p // tm
    adj_spec = pl.BlockSpec((tm, tk), lambda i, k: (i, k))
    out_spec = pl.BlockSpec((tm, f_out_p), lambda i, k: (i, 0))

    if use_premul:
        # Pre-apply the linear layer on bf16 MXU inputs with f32 accumulation.
        w_t = jnp.pad(weight.T, ((0, 0), (0, f_out_p - f_out))).astype(compute_dtype)
        v_c = jnp.pad(v_flat, ((0, M_p - M), (0, 0))).astype(compute_dtype)
        h_p = jnp.dot(v_c, w_t,
                      preferred_element_type=jnp.float32).astype(compute_dtype)

        feat_spec = (pl.BlockSpec((M_p, f_out_p), lambda i, k: (0, 0)) if resident
                     else pl.BlockSpec((tk, f_out_p), lambda i, k: (k, 0)))
        cost = pl.CostEstimate(
            flops=2 * M_p * M_p * f_out_p,
            transcendentals=0,
            bytes_accessed=(M_p * M_p * bpe
                            + (1 if resident else row_strips) * M_p * f_out_p * bpe
                            + M_p * f_out_p * out_bpe))
        out_flat = pl.pallas_call(
            _make_premul_kernel(tk, resident),
            out_shape=jax.ShapeDtypeStruct((M_p, f_out_p), out_dtype),
            grid_spec=pltpu.PrefetchScalarGridSpec(
                num_scalar_prefetch=0, grid=grid,
                in_specs=[adj_spec, feat_spec],
                out_specs=out_spec,
                scratch_shapes=[pltpu.VMEM((tm, f_out_p), jnp.float32)]),
            compiler_params=compiler_params,
            cost_estimate=cost,
        )(adj_p, h_p)
    else:
        v_c = jnp.pad(v_flat,
                      ((0, M_p - M), (0, f_in_p - f_in))).astype(compute_dtype)
        w_p = jnp.pad(weight.T,
                      ((0, f_in_p - f_in), (0, f_out_p - f_out))).astype(compute_dtype)

        feat_spec = (pl.BlockSpec((M_p, f_in_p), lambda i, k: (0, 0)) if resident
                     else pl.BlockSpec((tk, f_in_p), lambda i, k: (k, 0)))
        w_spec = pl.BlockSpec((f_in_p, f_out_p), lambda i, k: (0, 0))
        cost = pl.CostEstimate(
            flops=2 * M_p * M_p * f_in_p + 2 * M_p * f_in_p * f_out_p,
            transcendentals=0,
            bytes_accessed=(M_p * M_p * bpe
                            + (1 if resident else row_strips) * M_p * f_in_p * bpe
                            + f_in_p * f_out_p * bpe
                            + M_p * f_out_p * out_bpe))
        out_flat = pl.pallas_call(
            _make_fused_kernel(tk, resident),
            out_shape=jax.ShapeDtypeStruct((M_p, f_out_p), out_dtype),
            grid_spec=pltpu.PrefetchScalarGridSpec(
                num_scalar_prefetch=0, grid=grid,
                in_specs=[adj_spec, feat_spec, w_spec],
                out_specs=out_spec,
                scratch_shapes=[pltpu.VMEM((tm, f_in_p), jnp.float32)]),
            compiler_params=compiler_params,
            cost_estimate=cost,
        )(adj_p, v_c, w_p)

    output = out_flat[:M, :f_out].reshape(v_shape[:-1] + (f_out,))
    return output, adj


if __name__ == "__main__":
    key = jax.random.PRNGKey(0)
    k_v, k_adj, k_w, k_v2, k_adj2, k_w2 = jax.random.split(key, 6)

    # ---- test 1: 3-D input, fused path (f_out_p >= f_in_p) -----------------
    B, N, F_IN, F_OUT = 2, 16, 32, 64
    M = B * N
    v = jax.random.normal(k_v, (B, N, F_IN), dtype=jnp.float32)

    # Dense (block-diagonal per-batch) normalized adjacency of shape [B*N, B*N].
    a_raw = (jax.random.uniform(k_adj, (M, M)) > 0.7).astype(jnp.float32)
    block_mask = jnp.kron(jnp.eye(B, dtype=jnp.float32),
                          jnp.ones((N, N), dtype=jnp.float32))
    a = a_raw * block_mask
    a = a + a.T + jnp.eye(M, dtype=jnp.float32)           # symmetric, self-loops
    adj = a / jnp.maximum(jnp.sum(a, axis=1, keepdims=True), 1.0)

    # nn.Linear(in_features, out_features, bias=False): weight shape [F_out, F_in]
    bound = 1.0 / (F_IN ** 0.5)
    weight = jax.random.uniform(k_w, (F_OUT, F_IN), dtype=jnp.float32,
                                minval=-bound, maxval=bound)

    out, _ = graph_convolution_forward(v, adj, weight)
    out = jax.block_until_ready(out)

    support = (adj @ v.reshape(M, F_IN)).reshape(B, N, F_IN)
    ref = jnp.maximum(jnp.einsum("bnf,of->bno", support, weight), 0.0)
    assert out.shape == (B, N, F_OUT)
    assert jnp.allclose(out, ref, atol=3e-2, rtol=3e-2), \
        f"test1 max abs diff = {float(jnp.max(jnp.abs(out - ref)))}"

    # ---- test 2: 2-D input, premul path (f_out_p < f_in_p), prepared adj ---
    M2, F_IN2, F_OUT2 = 48, 256, 32
    v2 = jax.random.normal(k_v2, (M2, F_IN2), dtype=jnp.float32)
    a2 = (jax.random.uniform(k_adj2, (M2, M2)) > 0.6).astype(jnp.float32)
    a2 = a2 + a2.T + jnp.eye(M2, dtype=jnp.float32)
    adj2 = a2 / jnp.maximum(jnp.sum(a2, axis=1, keepdims=True), 1.0)
    bound2 = 1.0 / (F_IN2 ** 0.5)
    weight2 = jax.random.uniform(k_w2, (F_OUT2, F_IN2), dtype=jnp.float32,
                                 minval=-bound2, maxval=bound2)

    adj2_prepared = prepare_adjacency(adj2)   # hoisted pad+cast (reused by layers)
    out2, _ = graph_convolution_forward(v2, adj2_prepared, weight2)
    out2 = jax.block_until_ready(out2)

    ref2 = jnp.maximum((adj2 @ v2) @ weight2.T, 0.0)
    assert out2.shape == (M2, F_OUT2)
    assert jnp.allclose(out2, ref2, atol=3e-2, rtol=3e-2), \
        f"test2 max abs diff = {float(jnp.max(jnp.abs(out2 - ref2)))}"

    print("KERNEL_OK")
</pallas_src>

<mosaic_0001>
module attributes {stable_mosaic.version = 11 : i64} {
  func.func @kernel(%arg0: i32, %arg1: i32, %arg2: memref<128x128xbf16, #tpu.memory_space<vmem>>, %arg3: memref<128x128xbf16, #tpu.memory_space<vmem>>, %arg4: memref<128x128xbf16, #tpu.memory_space<vmem>>, %arg5: memref<128x128xf32, #tpu.memory_space<vmem>>, %arg6: memref<128x128xf32, #tpu.memory_space<vmem>>) attributes {dimension_semantics = [#tpu.dimension_semantics<parallel>, #tpu.dimension_semantics<arbitrary>], iteration_bounds = array<i64: 1, 1>, scalar_prefetch = 0 : i64, scratch_operands = 1 : i64, tpu.core_type = #tpu.core_type<tc>, window_params = [{transform_indices = @transform_0, window_bounds = array<i64: 128, 128>}, {pipeline_mode = #tpu.pipeline_mode<synchronous>, transform_indices = @transform_1, window_bounds = array<i64: 128, 128>}, {pipeline_mode = #tpu.pipeline_mode<synchronous>, transform_indices = @transform_2, window_bounds = array<i64: 128, 128>}, {transform_indices = @transform_3, window_bounds = array<i64: 128, 128>}]} {
    %c0_i32 = arith.constant 0 : i32
    %0 = arith.cmpi eq, %arg1, %c0_i32 : i32
    %1 = arith.extui %0 : i1 to i32
    %c0_i32_0 = arith.constant 0 : i32
    %2 = arith.cmpi ne, %1, %c0_i32_0 : i32
    scf.if %2 {
      %cst_9 = arith.constant 0.000000e+00 : f32
      %15 = vector.broadcast %cst_9 : f32 to vector<128x128xf32>
      %c0_10 = arith.constant 0 : index
      %c0_11 = arith.constant 0 : index
      %16 = vector.load %arg6[%c0_10, %c0_11] : memref<128x128xf32, #tpu.memory_space<vmem>>, vector<128x128xf32>
      tpu.vector_store %arg6[%c0_10, %c0_11], %15 {strides = array<i32>} : memref<128x128xf32, #tpu.memory_space<vmem>>, vector<128x128xf32>,
    } else {
    }
    %c128_i32 = arith.constant 128 : i32
    %3 = arith.muli %arg1, %c128_i32 : i32
    %4 = tpu.assume_multiple %3, 128 : i32
    %5 = arith.index_cast %4 : i32 to index
    %c0 = arith.constant 0 : index
    %6 = vector.load %arg3[%5, %c0] : memref<128x128xbf16, #tpu.memory_space<vmem>>, vector<128x128xbf16>
    %c0_1 = arith.constant 0 : index
    %c0_2 = arith.constant 0 : index
    %7 = vector.load %arg6[%c0_1, %c0_2] : memref<128x128xf32, #tpu.memory_space<vmem>>, vector<128x128xf32>
    %c0_3 = arith.constant 0 : index
    %c0_4 = arith.constant 0 : index
    %8 = vector.load %arg2[%c0_3, %c0_4] : memref<128x128xbf16, #tpu.memory_space<vmem>>, vector<128x128xbf16>
    %cst = arith.constant dense<0.000000e+00> : vector<128x128xf32>
    %9 = tpu.matmul %8, %6, %cst {dimension_numbers = #tpu.dot_dimension_numbers<[1], [0], [0], [1], [0, 0, 1, 1], [], []>} : vector<128x128xbf16>, vector<128x128xbf16>, vector<128x128xf32> -> vector<128x128xf32>
    %10 = arith.addf %7, %9 : vector<128x128xf32>
    %c0_5 = arith.constant 0 : index
    %c0_6 = arith.constant 0 : index
    %11 = vector.load %arg6[%c0_5, %c0_6] : memref<128x128xf32, #tpu.memory_space<vmem>>, vector<128x128xf32>
    tpu.vector_store %arg6[%c0_5, %c0_6], %10 {strides = array<i32>} : memref<128x128xf32, #tpu.memory_space<vmem>>, vector<128x128xf32>,
    %c0_i32_7 = arith.constant 0 : i32
    %12 = arith.cmpi eq, %arg1, %c0_i32_7 : i32
    %13 = arith.extui %12 : i1 to i32
    %c0_i32_8 = arith.constant 0 : i32
    %14 = arith.cmpi ne, %13, %c0_i32_8 : i32
    scf.if %14 {
      %c0_9 = arith.constant 0 : index
      %c0_10 = arith.constant 0 : index
      %15 = vector.load %arg6[%c0_9, %c0_10] : memref<128x128xf32, #tpu.memory_space<vmem>>, vector<128x128xf32>
      %16 = arith.truncf %15 : vector<128x128xf32> to vector<128x128xbf16>
      %c0_11 = arith.constant 0 : index
      %c0_12 = arith.constant 0 : index
      %17 = vector.load %arg4[%c0_11, %c0_12] : memref<128x128xbf16, #tpu.memory_space<vmem>>, vector<128x128xbf16>
      %cst_13 = arith.constant dense<0.000000e+00> : vector<128x128xf32>
      %18 = tpu.matmul %16, %17, %cst_13 {dimension_numbers = #tpu.dot_dimension_numbers<[1], [0], [0], [1], [0, 0, 1, 1], [], []>} : vector<128x128xbf16>, vector<128x128xbf16>, vector<128x128xf32> -> vector<128x128xf32>
      %cst_14 = arith.constant 0.000000e+00 : f32
      %19 = vector.broadcast %cst_14 : f32 to vector<128x128xf32>
      %20 = arith.maximumf %18, %19 : vector<128x128xf32>
      %c0_15 = arith.constant 0 : index
      %c0_16 = arith.constant 0 : index
      %21 = vector.load %arg5[%c0_15, %c0_16] : memref<128x128xf32, #tpu.memory_space<vmem>>, vector<128x128xf32>
      tpu.vector_store %arg5[%c0_15, %c0_16], %20 {strides = array<i32>} : memref<128x128xf32, #tpu.memory_space<vmem>>, vector<128x128xf32>,
    } else {
    }
    return
  }
  func.func @transform_0(%arg0: i32, %arg1: i32) -> (i32, i32) {
    %c0_i32 = arith.constant 0 : i32
    return %arg0, %arg1 : i32, i32
  }
  func.func @transform_1(%arg0: i32, %arg1: i32) -> (i32, i32) {
    %c0_i32 = arith.constant 0 : i32
    %c0_i32_0 = arith.constant 0 : i32
    %c0_i32_1 = arith.constant 0 : i32
    return %c0_i32, %c0_i32_0 : i32, i32
  }
  func.func @transform_2(%arg0: i32, %arg1: i32) -> (i32, i32) {
    %c0_i32 = arith.constant 0 : i32
    %c0_i32_0 = arith.constant 0 : i32
    %c0_i32_1 = arith.constant 0 : i32
    return %c0_i32, %c0_i32_0 : i32, i32
  }
  func.func @transform_3(%arg0: i32, %arg1: i32) -> (i32, i32) {
    %c0_i32 = arith.constant 0 : i32
    %c0_i32_0 = arith.constant 0 : i32
    return %arg0, %c0_i32 : i32, i32
  }
}

</mosaic_0001>

<bundles_post_ra>
// kernel: tpu_custom_call.1
= control target key start
LH: loop header
LB: loop body
LE: loop exit
PB: predicated region body
PF: predicated region fallthrough
CT: control target
= control target key end

     0   :  { %8 = vsyncpa [#allocation4], 0  ;;  %s873_s0 = inlined_call_operand.hbm [shape: bf16[128,128], index: 0, kind: input, shape index: {}]   ;;  %s874_s1 = inlined_call_operand.hbm [shape: bf16[128,128], index: 1, kind: input, shape index: {}]   ;;  %s875_s2 = inlined_call_operand.hbm [shape: bf16[128,128], index: 2, kind: input, shape index: {}]   ;;  %s876_s3 = inlined_call_operand.hbm [shape: f32[128,128], index: 3, kind: output, shape index: {}]  }
   0x1   :  { %9 = vsyncpa [#allocation7], 0 }
   0x2   :  { %10 = vsyncpa [#allocation5], 0  ;;  %s833_s12 = smov [#allocation6]   ;;  %s834_s14 = smov [#allocation3]  }
   0x3   :  { %s28_s13 = sshll.u32 %s833_s12, 4  ;;  %s16_s15 = sshll.u32 %s834_s14, 4  ;;  %s29_s13 = int_to_ptr.vmem [resolvable:$true] %s28_s13  ;;  %s17_s15 = int_to_ptr.vmem [resolvable:$true] %s16_s15 }
   0x4   :  { %s755_s16 = scalar_lea.vmem %s29_s13, 1024  ;;  %p760_p1 = scmp.lt.s32.totalorder %s29_s13, %s29_s13 }
   0x5   :  { %p756_p0 = scmp.ne.s32.totalorder %s29_s13, %s755_s16  ;;  %p761_p2 = scmp.lt.s32.totalorder %s755_s16, %s755_s16 }
   0x7   :  { %p762_p3 = por %p761_p2, %p760_p1 }
   0x9   :  { %p763_p4 = pnand %p762_p3, %p756_p0 }
   0xb   :  { %766 = shalt.err (!%p763_p4)
}
   0xc   :  { %s835_s17 = smov 64   ;;  %s836_s18 = smov 4  }
   0xd   :  { %34 = dma.hbm_to_vmem [thread:$0]  %s874_s1, 1024, %s29_s13, [#allocation7], %s835_s17, %s835_s17, %s836_s18  }
   0xe   :  { %s775_s21 = scalar_lea.vmem %s17_s15, 1024  ;;  %p780_p6 = scmp.lt.s32.totalorder %s17_s15, %s17_s15 }
   0xf   :  { %p776_p5 = scmp.ne.s32.totalorder %s17_s15, %s775_s21  ;;  %p781_p7 = scmp.lt.s32.totalorder %s775_s21, %s775_s21 }
  0x11   :  { %p782_p8 = por %p781_p7, %p780_p6 }
  0x13   :  { %p783_p9 = pnand %p782_p8, %p776_p5 }
  0x15   :  { %786 = shalt.err (!%p783_p9)
}
  0x16   :  { %22 = dma.hbm_to_vmem [thread:$0]  %s873_s0, 1024, %s17_s15, [#allocation4], %s835_s17, %s835_s17, %s836_s18  }
  0x17   :  { %s837_s24 = smov [#allocation8]  }
  0x18   :  { %s40_s25 = sshll.u32 %s837_s24, 4  ;;  %s41_s25 = int_to_ptr.vmem [resolvable:$true] %s40_s25 }
  0x19   :  { %s795_s26 = scalar_lea.vmem %s41_s25, 1024  ;;  %p800_p11 = scmp.lt.s32.totalorder %s41_s25, %s41_s25 }
  0x1a   :  { %p796_p10 = scmp.ne.s32.totalorder %s41_s25, %s795_s26  ;;  %p801_p12 = scmp.lt.s32.totalorder %s795_s26, %s795_s26 }
  0x1c   :  { %p802_p13 = por %p801_p12, %p800_p11 }
  0x1e   :  { %p803_p0 = pnand %p802_p13, %p796_p10 }
  0x20   :  { %806 = shalt.err (!%p803_p0)
}
  0x21   :  { %46 = dma.hbm_to_vmem [thread:$0]  %s875_s2, 1024, %s41_s25, [#allocation7], %s835_s17, %s835_s17, %s836_s18  }
  0x22   :  { %827 = dma.done.wait [#allocation4], 1024  }
  0x23   :  { %828 = vsyncadd [#allocation4], 4294966272 }
  0x24   :  { %829 = dma.done.wait [#allocation7], 2048  }
  0x25   :  { %830 = vsyncadd [#allocation7], 4294965248  ;;  %v723_v0 = vld [vmem:[#allocation6 + $0x38] sm:$0xff]   ;;  %v724_v1 = vld [vmem:[#allocation6 + $0x30] sm:$0xff]   ;;  %s838_s0 = smov [#allocation9]  }
  0x26   :  { %651 = vmatprep.subr.bf16.mxu0 %v723_v0  ;;  %v725_v2 = vld [vmem:[#allocation6 + $0x28] sm:$0xff]   ;;  %v726_v3 = vld [vmem:[#allocation6 + $0x20] sm:$0xff]   ;;  %v727_v5 = vld [vmem:[#allocation6 + $0x18] sm:$0xff]   ;;  %s580_s2 = sshll.u32 %s838_s0, 4  ;;  %s581_s2 = int_to_ptr.vmem [resolvable:$true] %s580_s2 }
  0x27   :  { %652 = vmatpush3.bf16.msra.mxu0 %v723_v0  ;;  %v731_v4 = vld [vmem:[#allocation3] sm:$0xff]   ;;  %v728_v6 = vld [vmem:[#allocation6 + $0x10] sm:$0xff]   ;;  %v739_v7 = vld [vmem:[#allocation8 + $0x38] sm:$0xff]   ;;  %s807_s28 = scalar_lea.vmem %s581_s2, 2048  ;;  %p812_p2 = scmp.lt.s32.totalorder %s581_s2, %s581_s2 }
  0x28   :  { %653 = vmatprep.subr.bf16.mxu0 %v724_v1  ;;  %667 = vmatprep.mubr.bf16.mxu0 %v731_v4  ;;  %v740_v8 = vld [vmem:[#allocation8 + $0x30] sm:$0xff]   ;;  %v729_v9 = vld [vmem:[#allocation6 + $0x8] sm:$0xff]   ;;  %v730_v11 = vld [vmem:[#allocation6] sm:$0xff]   ;;  %p808_p1 = scmp.ne.s32.totalorder %s581_s2, %s807_s28  ;;  %p813_p3 = scmp.lt.s32.totalorder %s807_s28, %s807_s28 }
  0x29   :  { %683 = vmatprep.subr.bf16.mxu1 %v739_v7  ;;  %v741_v10 = vld [vmem:[#allocation8 + $0x28] sm:$0xff]   ;;  %v742_v12 = vld [vmem:[#allocation8 + $0x20] sm:$0xff]   ;;  %v743_v13 = vld [vmem:[#allocation8 + $0x18] sm:$0xff]  }
  0x2a   :  { %684 = vmatpush3.bf16.msra.mxu1 %v739_v7  ;;  %v732_v14 = vld [vmem:[#allocation3 + $0x8] sm:$0xff]   ;;  %v733_v15 = vld [vmem:[#allocation3 + $0x10] sm:$0xff]   ;;  %v734_v17 = vld [vmem:[#allocation3 + $0x18] sm:$0xff]   ;;  %p814_p4 = por %p813_p3, %p812_p2 }
  0x2b   :  { %654 = vmatpush3.bf16.msra.mxu0 %v724_v1  ;;  %685 = vmatprep.subr.bf16.mxu1 %v740_v8  ;;  %v744_v16 = vld [vmem:[#allocation8 + $0x10] sm:$0xff]   ;;  %v735_v18 = vld [vmem:[#allocation3 + $0x20] sm:$0xff]   ;;  %v736_v19 = vld [vmem:[#allocation3 + $0x28] sm:$0xff]  }
  0x2c   :  { %655 = vmatprep.subr.bf16.mxu0 %v725_v2  ;;  %v737_v20 = vld [vmem:[#allocation3 + $0x30] sm:$0xff]   ;;  %v738_v21 = vld [vmem:[#allocation3 + $0x38] sm:$0xff]   ;;  %v745_v22 = vld [vmem:[#allocation8 + $0x8] sm:$0xff]   ;;  %p815_p5 = pnand %p814_p4, %p808_p1 }
  0x2d   :  { %v746_v23 = vld [vmem:[#allocation8] sm:$0xff]  }
  0x2e   :  { %686 = vmatpush3.bf16.msra.mxu1 %v740_v8 }
  0x2f   :  { %656 = vmatpush3.bf16.msra.mxu0 %v725_v2  ;;  %687 = vmatprep.subr.bf16.mxu1 %v741_v10 }
  0x30   :  { %657 = vmatprep.subr.bf16.mxu0 %v726_v3 }
  0x32   :  { %688 = vmatpush3.bf16.msra.mxu1 %v741_v10 }
  0x33   :  { %658 = vmatpush3.bf16.msra.mxu0 %v726_v3  ;;  %689 = vmatprep.subr.bf16.mxu1 %v742_v12 }
  0x34   :  { %659 = vmatprep.subr.bf16.mxu0 %v727_v5 }
  0x36   :  { %690 = vmatpush3.bf16.msra.mxu1 %v742_v12 }
  0x37   :  { %660 = vmatpush3.bf16.msra.mxu0 %v727_v5  ;;  %691 = vmatprep.subr.bf16.mxu1 %v743_v13 }
  0x38   :  { %661 = vmatprep.subr.bf16.mxu0 %v728_v6 }
  0x3a   :  { %692 = vmatpush3.bf16.msra.mxu1 %v743_v13 }
  0x3b   :  { %662 = vmatpush3.bf16.msra.mxu0 %v728_v6  ;;  %693 = vmatprep.subr.bf16.mxu1 %v744_v16 }
  0x3c   :  { %663 = vmatprep.subr.bf16.mxu0 %v729_v9 }
  0x3e   :  { %694 = vmatpush3.bf16.msra.mxu1 %v744_v16 }
  0x3f   :  { %664 = vmatpush3.bf16.msra.mxu0 %v729_v9  ;;  %695 = vmatprep.subr.bf16.mxu1 %v745_v22 }
  0x40   :  { %665 = vmatprep.subr.bf16.mxu0 %v730_v11 }
  0x42   :  { %696 = vmatpush3.bf16.msra.mxu1 %v745_v22 }
  0x43   :  { %666 = vmatpush3.bf16.msra.mxu0 %v730_v11  ;;  %697 = vmatprep.subr.bf16.mxu1 %v746_v23 }
  0x46   :  { %668 = vmatmul.mubr.bf16.vlgmr.msra.gmra.mxu0 %v732_v14  ;;  %698 = vmatpush3.bf16.msra.mxu1 %v746_v23 }
  0x47   :  { %671 = vmatprep.mubr.bf16.mxu0 %v733_v15 }
  0x4e   :  { %672 = vmatmul.mubr.bf16.gmra.mxu0 %v734_v17 }
  0x4f   :  { %675 = vmatprep.mubr.bf16.mxu0 %v735_v18 }
  0x56   :  { %676 = vmatmul.mubr.bf16.gmra.mxu0 %v736_v19 }
  0x57   :  { %679 = vmatprep.mubr.bf16.mxu0 %v737_v20 }
  0x5e   :  { %680 = vmatmul.mubr.bf16.gmra.mxu0 %v738_v21 }
 0x106   :  { %v669_v24 = vpop.f32.mrf.mxu0 }
 0x108   :  { %v260_v25 = vpop.f32.mrf.mxu0 }
 0x10a   :  { %v670_v26 = vpop.f32.mrf.mxu0 }
 0x10b   :  { %v375_v29 = vpack.c.bf16 %v670_v26, %v669_v24 }
 0x10c   :  { %v263_v27 = vpop.f32.mrf.mxu0 }
 0x10d   :  { %v374_v28 = vpack.c.bf16 %v263_v27, %v260_v25 }
 0x10e   :  { %v673_v30 = vpop.f32.mrf.mxu0 }
 0x10f   :  { %699 = vmatprep.mubr.bf16.mxu1 %v374_v28 }
 0x110   :  { %v276_v31 = vpop.f32.mrf.mxu0  ;;  %700 = vmatmul.mubr.bf16.vlgmr.msra.gmra.mxu1 %v375_v29 }
 0x112   :  { %v674_v32 = vpop.f32.mrf.mxu0 }
 0x113   :  { %v377_v35 = vpack.c.bf16 %v674_v32, %v673_v30 }
 0x114   :  { %v279_v33 = vpop.f32.mrf.mxu0 }
 0x115   :  { %v376_v34 = vpack.c.bf16 %v279_v33, %v276_v31 }
 0x116   :  { %v677_v36 = vpop.f32.mrf.mxu0 }
 0x117   :  { %703 = vmatprep.mubr.bf16.mxu1 %v376_v34 }
 0x118   :  { %v292_v37 = vpop.f32.mrf.mxu0  ;;  %704 = vmatmul.mubr.bf16.gmra.mxu1 %v377_v35 }
 0x11a   :  { %v678_v38 = vpop.f32.mrf.mxu0 }
 0x11b   :  { %v379_v41 = vpack.c.bf16 %v678_v38, %v677_v36 }
 0x11c   :  { %v295_v39 = vpop.f32.mrf.mxu0 }
 0x11d   :  { %v378_v40 = vpack.c.bf16 %v295_v39, %v292_v37 }
 0x11e   :  { %v681_v42 = vpop.f32.mrf.mxu0 }
 0x11f   :  { %707 = vmatprep.mubr.bf16.mxu1 %v378_v40 }
 0x120   :  { %v308_v43 = vpop.f32.mrf.mxu0  ;;  %708 = vmatmul.mubr.bf16.gmra.mxu1 %v379_v41 }
 0x122   :  { %v682_v44 = vpop.f32.mrf.mxu0 }
 0x123   :  { %v381_v47 = vpack.c.bf16 %v682_v44, %v681_v42 }
 0x124   :  { %v311_v45 = vpop.f32.mrf.mxu0 }
 0x125   :  { %v380_v46 = vpack.c.bf16 %v311_v45, %v308_v43 }
 0x127   :  { %711 = vmatprep.mubr.bf16.mxu1 %v380_v46 }
 0x128   :  { %712 = vmatmul.mubr.bf16.gmra.mxu1 %v381_v47 }
 0x1d0   :  { %v701_v48 = vpop.f32.mrf.mxu1 }
 0x1d1   :  { %v545_v49 = vmax.f32 %v701_v48, 0.0 }
 0x1d2   :  { %v480_v50 = vpop.f32.mrf.mxu1 }
 0x1d3   :  { %561 = vst [vmem:[#allocation9 + $0x10] sm:$0xff] %v545_v49  ;;  %v543_v51 = vmax.f32 %v480_v50, 0.0 }
 0x1d4   :  { %v702_v52 = vpop.f32.mrf.mxu1 }
 0x1d5   :  { %559 = vst [vmem:[#allocation9] sm:$0xff] %v543_v51  ;;  %v546_v53 = vmax.f32 %v702_v52, 0.0 }
 0x1d6   :  { %v483_v54 = vpop.f32.mrf.mxu1 }
 0x1d7   :  { %562 = vst [vmem:[#allocation9 + $0x18] sm:$0xff] %v546_v53  ;;  %v544_v55 = vmax.f32 %v483_v54, 0.0 }
 0x1d8   :  { %v705_v56 = vpop.f32.mrf.mxu1 }
 0x1d9   :  { %560 = vst [vmem:[#allocation9 + $0x8] sm:$0xff] %v544_v55  ;;  %v549_v57 = vmax.f32 %v705_v56, 0.0 }
 0x1da   :  { %v496_v58 = vpop.f32.mrf.mxu1 }
 0x1db   :  { %565 = vst [vmem:[#allocation9 + $0x30] sm:$0xff] %v549_v57  ;;  %v547_v59 = vmax.f32 %v496_v58, 0.0 }
 0x1dc   :  { %v706_v60 = vpop.f32.mrf.mxu1 }
 0x1dd   :  { %563 = vst [vmem:[#allocation9 + $0x20] sm:$0xff] %v547_v59  ;;  %v550_v61 = vmax.f32 %v706_v60, 0.0 }
 0x1de   :  { %v499_v62 = vpop.f32.mrf.mxu1 }
 0x1df   :  { %566 = vst [vmem:[#allocation9 + $0x38] sm:$0xff] %v550_v61  ;;  %v548_v63 = vmax.f32 %v499_v62, 0.0 }
 0x1e0   :  { %v709_v0 = vpop.f32.mrf.mxu1 }
 0x1e1   :  { %564 = vst [vmem:[#allocation9 + $0x28] sm:$0xff] %v548_v63  ;;  %v553_v1 = vmax.f32 %v709_v0, 0.0 }
 0x1e2   :  { %v512_v2 = vpop.f32.mrf.mxu1 }
 0x1e3   :  { %569 = vst [vmem:[#allocation9 + $0x50] sm:$0xff] %v553_v1  ;;  %v551_v3 = vmax.f32 %v512_v2, 0.0 }
 0x1e4   :  { %v710_v4 = vpop.f32.mrf.mxu1 }
 0x1e5   :  { %567 = vst [vmem:[#allocation9 + $0x40] sm:$0xff] %v551_v3  ;;  %v554_v5 = vmax.f32 %v710_v4, 0.0 }
 0x1e6   :  { %v515_v6 = vpop.f32.mrf.mxu1 }
 0x1e7   :  { %570 = vst [vmem:[#allocation9 + $0x58] sm:$0xff] %v554_v5  ;;  %v552_v7 = vmax.f32 %v515_v6, 0.0 }
 0x1e8   :  { %v713_v8 = vpop.f32.mrf.mxu1 }
 0x1e9   :  { %568 = vst [vmem:[#allocation9 + $0x48] sm:$0xff] %v552_v7  ;;  %v557_v9 = vmax.f32 %v713_v8, 0.0 }
 0x1ea   :  { %v528_v10 = vpop.f32.mrf.mxu1 }
 0x1eb   :  { %573 = vst [vmem:[#allocation9 + $0x70] sm:$0xff] %v557_v9  ;;  %v555_v11 = vmax.f32 %v528_v10, 0.0 }
 0x1ec   :  { %v714_v12 = vpop.f32.mrf.mxu1 }
 0x1ed   :  { %571 = vst [vmem:[#allocation9 + $0x60] sm:$0xff] %v555_v11  ;;  %v558_v13 = vmax.f32 %v714_v12, 0.0 }
 0x1ee   :  { %v531_v14 = vpop.f32.mrf.mxu1 }
 0x1ef   :  { %574 = vst [vmem:[#allocation9 + $0x78] sm:$0xff] %v558_v13  ;;  %v556_v15 = vmax.f32 %v531_v14, 0.0 }
 0x1f1   :  { %572 = vst [vmem:[#allocation9 + $0x68] sm:$0xff] %v556_v15 }
 0x1f2   :  { %818 = shalt.err (!%p815_p5)
}
 0x1f3   :  { %s839_s29 = smov 128   ;;  %s840_s30 = smov 8  }
 0x1f4   :  { %586 = dma.vmem_to_hbm [thread:$0]  %s581_s2, 2048, %s876_s3, [#allocation5], %s839_s29, %s839_s29, %s840_s30  }
 0x1f5   :  { %831 = dma.done.wait [#allocation5], 2048  }
 0x1f6   :  { %832 = vsyncadd [#allocation5], 4294965248 }
 0x1f7   :  { %590 = vsyncpa [#allocation4], 1 }
 0x1f8   :  { %591 = vsyncpa [#allocation7], 1 }
 0x1f9   :  { %592 = vsyncpa [#allocation5], 1 }

</bundles_post_ra>
